<compile_context>
chip_gen: v5e
topology: v5e:2x2
jax: 0.10.0
libtpu: 0.0.40
codegen_flags: <defaults>
</compile_context>

<pallas_src>
import functools

import jax
import jax.numpy as jnp
from jax.experimental import pallas as pl
from jax.experimental.pallas import tpu as pltpu


def _gap_kernel(x_ref, o_ref, acc_ref, *, hw, tk):
    """x_ref: (TB, TK, C) tile; acc_ref: (TB, 1, C) f32 running sum; o_ref: (TB, 1, C)."""
    k = pl.program_id(1)

    @pl.when(k == 0)
    def _init():
        acc_ref[...] = jnp.zeros_like(acc_ref)

    x = x_ref[...].astype(jnp.float32)  # (TB, TK, C)
    if hw % tk != 0:
        # Mask rows past H*W on the final (partial) spatial block.
        row = jax.lax.broadcasted_iota(jnp.int32, x.shape, 1)
        x = jnp.where(k * tk + row < hw, x, 0.0)
    acc_ref[...] += jnp.sum(x, axis=1, keepdims=True)  # VPU sublane accumulate

    @pl.when(k == pl.num_programs(1) - 1)
    def _finalize():
        # Hoisted scale: one multiply per output tile (sum-then-scale).
        o_ref[...] = (acc_ref[...] * (1.0 / hw)).astype(o_ref.dtype)


def global_avg_pool2d(x, *, target_block_bytes=2 * 1024 * 1024):
    """x: (N, C, H, W) -> (N, C), matching F.adaptive_avg_pool2d(x, 1).squeeze."""
    n, c, h, w = x.shape
    hw = h * w

    # Channels-on-lanes layout: (N, C, H, W) -> (N, H*W, C). Plain-JAX plumbing.
    x3 = jnp.transpose(x, (0, 2, 3, 1)).reshape(n, hw, c)

    itemsize = jnp.dtype(x.dtype).itemsize
    sublane = max(8, 8 * (4 // itemsize))        # 8 (f32) / 16 (bf16) / 32 (i8)
    lane_c = pl.cdiv(c, 128) * 128               # lane-padded channel width
    row_bytes = lane_c * itemsize

    # Spatial tile: ~target_block_bytes per input block (sublane-aligned).
    tk = max(sublane, (target_block_bytes // row_bytes) // sublane * sublane)
    tb = 1
    if tk >= hw:
        tk = hw                                   # full spatial extent per block
        sample_bytes = pl.cdiv(hw, sublane) * sublane * row_bytes
        tb = int(max(1, min(n, target_block_bytes // max(1, sample_bytes))))
    kt = pl.cdiv(hw, tk)

    in_block_bytes = tb * pl.cdiv(tk, sublane) * sublane * row_bytes
    # 2x double-buffered input + output/accumulator + headroom; capped so it is
    # safe on every generation (v7x scoped default 32 MiB, 64 MiB physical).
    vmem_limit = int(min(32 * 1024 * 1024,
                         max(16 * 1024 * 1024, 4 * in_block_bytes + 2 * 1024 * 1024)))

    kernel = functools.partial(_gap_kernel, hw=hw, tk=tk)

    out = pl.pallas_call(
        kernel,
        out_shape=jax.ShapeDtypeStruct((n, 1, c), x.dtype),
        grid_spec=pltpu.PrefetchScalarGridSpec(
            num_scalar_prefetch=0,
            grid=(pl.cdiv(n, tb), kt),
            in_specs=[pl.BlockSpec((tb, tk, c), lambda i, k: (i, k, 0))],
            out_specs=pl.BlockSpec((tb, 1, c), lambda i, k: (i, 0, 0)),
            scratch_shapes=[pltpu.VMEM((tb, 1, c), jnp.float32)],
        ),
        compiler_params=pltpu.CompilerParams(
            dimension_semantics=("parallel", "arbitrary"),
            vmem_limit_bytes=vmem_limit,
        ),
    )(x3)
    return out.reshape(n, c)


if __name__ == "__main__":
    key = jax.random.PRNGKey(0)
    x = jax.random.normal(key, (2, 4, 16, 16), dtype=jnp.float32)

    y = global_avg_pool2d(x)
    jax.block_until_ready(y)

    # Reference check (same semantics as adaptive_avg_pool2d(x, 1).squeeze).
    ref = jnp.mean(x, axis=(2, 3))
    assert y.shape == (2, 4), y.shape
    assert jnp.allclose(y, ref, atol=1e-5), "mismatch vs reference mean"

    print("KERNEL_OK")
</pallas_src>

<mosaic_0001>
module attributes {stable_mosaic.version = 11 : i64} {
  func.func @_gap_kernel(%arg0: i32, %arg1: i32, %arg2: memref<2x256x4xf32, #tpu.memory_space<vmem>>, %arg3: memref<2x1x4xf32, #tpu.memory_space<vmem>>, %arg4: memref<2x1x4xf32, #tpu.memory_space<vmem>>) attributes {dimension_semantics = [#tpu.dimension_semantics<parallel>, #tpu.dimension_semantics<arbitrary>], iteration_bounds = array<i64: 1, 1>, scalar_prefetch = 0 : i64, scratch_operands = 1 : i64, tpu.core_type = #tpu.core_type<tc>, window_params = [{transform_indices = @transform_0, window_bounds = array<i64: 2, 256, 4>}, {transform_indices = @transform_1, window_bounds = array<i64: 2, 1, 4>}]} {
    %c0_i32 = arith.constant 0 : i32
    %0 = arith.cmpi eq, %arg1, %c0_i32 : i32
    %1 = arith.extui %0 : i1 to i32
    %c0_i32_0 = arith.constant 0 : i32
    %2 = arith.cmpi ne, %1, %c0_i32_0 : i32
    scf.if %2 {
      %cst_11 = arith.constant 0.000000e+00 : f32
      %12 = vector.broadcast %cst_11 : f32 to vector<2x1x4xf32>
      %c0_12 = arith.constant 0 : index
      %c0_13 = arith.constant 0 : index
      %c0_14 = arith.constant 0 : index
      %13 = vector.load %arg4[%c0_12, %c0_13, %c0_14] : memref<2x1x4xf32, #tpu.memory_space<vmem>>, vector<2x1x4xf32>
      tpu.vector_store %arg4[%c0_12, %c0_13, %c0_14], %12 {strides = array<i32>} : memref<2x1x4xf32, #tpu.memory_space<vmem>>, vector<2x1x4xf32>,
    } else {
    }
    %c0 = arith.constant 0 : index
    %c0_1 = arith.constant 0 : index
    %c0_2 = arith.constant 0 : index
    %3 = vector.load %arg2[%c0, %c0_1, %c0_2] : memref<2x256x4xf32, #tpu.memory_space<vmem>>, vector<2x256x4xf32>
    %c0_3 = arith.constant 0 : index
    %c0_4 = arith.constant 0 : index
    %c0_5 = arith.constant 0 : index
    %4 = vector.load %arg4[%c0_3, %c0_4, %c0_5] : memref<2x1x4xf32, #tpu.memory_space<vmem>>, vector<2x1x4xf32>
    %cst = arith.constant dense<0.000000e+00> : vector<2x4xf32>
    %5 = vector.multi_reduction <add>, %3, %cst [1] : vector<2x256x4xf32> to vector<2x4xf32>
    %6 = vector.shape_cast %5 : vector<2x4xf32> to vector<2x1x4xf32>
    %7 = arith.addf %4, %6 : vector<2x1x4xf32>
    %c0_6 = arith.constant 0 : index
    %c0_7 = arith.constant 0 : index
    %c0_8 = arith.constant 0 : index
    %8 = vector.load %arg4[%c0_6, %c0_7, %c0_8] : memref<2x1x4xf32, #tpu.memory_space<vmem>>, vector<2x1x4xf32>
    tpu.vector_store %arg4[%c0_6, %c0_7, %c0_8], %7 {strides = array<i32>} : memref<2x1x4xf32, #tpu.memory_space<vmem>>, vector<2x1x4xf32>,
    %c0_i32_9 = arith.constant 0 : i32
    %9 = arith.cmpi eq, %arg1, %c0_i32_9 : i32
    %10 = arith.extui %9 : i1 to i32
    %c0_i32_10 = arith.constant 0 : i32
    %11 = arith.cmpi ne, %10, %c0_i32_10 : i32
    scf.if %11 {
      %c0_11 = arith.constant 0 : index
      %c0_12 = arith.constant 0 : index
      %c0_13 = arith.constant 0 : index
      %12 = vector.load %arg4[%c0_11, %c0_12, %c0_13] : memref<2x1x4xf32, #tpu.memory_space<vmem>>, vector<2x1x4xf32>
      %cst_14 = arith.constant 3.906250e-03 : f32
      %13 = vector.broadcast %cst_14 : f32 to vector<2x1x4xf32>
      %14 = arith.mulf %12, %13 : vector<2x1x4xf32>
      %c0_15 = arith.constant 0 : index
      %c0_16 = arith.constant 0 : index
      %c0_17 = arith.constant 0 : index
      %15 = vector.load %arg3[%c0_15, %c0_16, %c0_17] : memref<2x1x4xf32, #tpu.memory_space<vmem>>, vector<2x1x4xf32>
      tpu.vector_store %arg3[%c0_15, %c0_16, %c0_17], %14 {strides = array<i32>} : memref<2x1x4xf32, #tpu.memory_space<vmem>>, vector<2x1x4xf32>,
    } else {
    }
    return
  }
  func.func @transform_0(%arg0: i32, %arg1: i32) -> (i32, i32, i32) {
    %c0_i32 = arith.constant 0 : i32
    %c0_i32_0 = arith.constant 0 : i32
    return %arg0, %arg1, %c0_i32 : i32, i32, i32
  }
  func.func @transform_1(%arg0: i32, %arg1: i32) -> (i32, i32, i32) {
    %c0_i32 = arith.constant 0 : i32
    %c0_i32_0 = arith.constant 0 : i32
    %c0_i32_1 = arith.constant 0 : i32
    return %arg0, %c0_i32, %c0_i32_0 : i32, i32, i32
  }
}

</mosaic_0001>

<bundles_post_ra>
// kernel: tpu_custom_call.1
= control target key start
LH: loop header
LB: loop body
LE: loop exit
PB: predicated region body
PF: predicated region fallthrough
CT: control target
= control target key end

     0   :  { %vm13_vm0 = vcmask 24576   ;;  %vm82_vm1 = vcmask 31744   ;;  %v283_v3 = vmov 0.0   ;;  %s562_s0 = inlined_call_operand.vmem [shape: f32[2,256,4], index: 0, kind: input, shape index: {}]   ;;  %s563_s1 = inlined_call_operand.hbm [shape: f32[2,1,4], index: 1, kind: output, shape index: {}]  }
   0x1   :  { %v16_v0 = vld [vmem:[%s562_s0] sm:$0xff]  ;;  %v17_v1 = vld [vmem:[%s562_s0 + $0x8] sm:$0xff]  ;;  %v18_v2 = vld [vmem:[%s562_s0 + $0x10] sm:$0xff]  ;;  %14 = vst.msk [vmem:[#allocation2] sm:$0x1] %vm13_vm0, %v283_v3 }
   0x2   :  { %v19_v4 = vld [vmem:[%s562_s0 + $0x18] sm:$0xff]  ;;  %v83_v5 = vsel %vm82_vm1, %v16_v0, 0.0  ;;  %15 = vst.msk [vmem:[#allocation2 + $0x1] sm:$0x1] %vm13_vm0, %v283_v3  ;;  %v84_v6 = vsel %vm82_vm1, %v17_v1, 0.0  ;;  %v20_v7 = vld [vmem:[%s562_s0 + $0x20] sm:$0xff] }
   0x3   :  { %v85_v8 = vadd.f32 %v84_v6, %v83_v5  ;;  %v86_v9 = vsel %vm82_vm1, %v18_v2, 0.0  ;;  %v88_v10 = vsel %vm82_vm1, %v19_v4, 0.0  ;;  %v21_v11 = vld [vmem:[%s562_s0 + $0x28] sm:$0xff]  ;;  %v90_v13 = vsel %vm82_vm1, %v20_v7, 0.0  ;;  %v22_v14 = vld [vmem:[%s562_s0 + $0x30] sm:$0xff]  ;;  %v23_v17 = vld [vmem:[%s562_s0 + $0x38] sm:$0xff] }
   0x4   :  { %v92_v16 = vsel %vm82_vm1, %v21_v11, 0.0  ;;  %v24_v19 = vld [vmem:[%s562_s0 + $0x40] sm:$0xff]  ;;  %v94_v20 = vsel %vm82_vm1, %v22_v14, 0.0  ;;  %v49_v23 = vld [vmem:[%s562_s0 + $0x108] sm:$0xff]  ;;  %v50_v24 = vld [vmem:[%s562_s0 + $0x110] sm:$0xff]  ;;  %v96_v25 = vsel %vm82_vm1, %v23_v17, 0.0 }
   0x5   :  { %v87_v12 = vadd.f32 %v86_v9, %v85_v8  ;;  %v48_v22 = vld [vmem:[%s562_s0 + $0x100] sm:$0xff]  ;;  %v51_v26 = vld [vmem:[%s562_s0 + $0x118] sm:$0xff]  ;;  %v153_v28 = vsel %vm82_vm1, %v49_v23, 0.0  ;;  %v155_v29 = vsel %vm82_vm1, %v50_v24, 0.0  ;;  %v25_v30 = vld [vmem:[%s562_s0 + $0x48] sm:$0xff]  ;;  %v98_v34 = vsel %vm82_vm1, %v24_v19, 0.0 }
   0x6   :  { %v152_v27 = vsel %vm82_vm1, %v48_v22, 0.0  ;;  %v52_v32 = vld [vmem:[%s562_s0 + $0x120] sm:$0xff]  ;;  %v157_v35 = vsel %vm82_vm1, %v51_v26, 0.0  ;;  %v26_v36 = vld [vmem:[%s562_s0 + $0x50] sm:$0xff]  ;;  %v53_v38 = vld [vmem:[%s562_s0 + $0x128] sm:$0xff]  ;;  %v100_v40 = vsel %vm82_vm1, %v25_v30, 0.0 }
   0x7   :  { %v89_v15 = vadd.f32 %v88_v10, %v87_v12  ;;  %v154_v33 = vadd.f32 %v153_v28, %v152_v27  ;;  %v159_v41 = vsel %vm82_vm1, %v52_v32, 0.0  ;;  %v27_v42 = vld [vmem:[%s562_s0 + $0x58] sm:$0xff]  ;;  %v54_v44 = vld [vmem:[%s562_s0 + $0x130] sm:$0xff]  ;;  %v102_v46 = vsel %vm82_vm1, %v26_v36, 0.0 }
   0x8   :  { %v161_v47 = vsel %vm82_vm1, %v53_v38, 0.0 }
   0x9   :  { %v91_v18 = vadd.f32 %v90_v13, %v89_v15  ;;  %v156_v39 = vadd.f32 %v155_v29, %v154_v33 }
   0xb   :  { %v93_v21 = vadd.f32 %v92_v16, %v91_v18  ;;  %v158_v45 = vadd.f32 %v157_v35, %v156_v39 }
   0xd   :  { %v95_v31 = vadd.f32 %v94_v20, %v93_v21 }
   0xf   :  { %v97_v37 = vadd.f32 %v96_v25, %v95_v31 }
  0x11   :  { %v99_v43 = vadd.f32 %v98_v34, %v97_v37 }
  0x12   :  { %6 = vsyncpa [#allocation4], 0  ;;  %v28_v48 = vld [vmem:[%s562_s0 + $0x60] sm:$0xff]  ;;  %v55_v50 = vld [vmem:[%s562_s0 + $0x138] sm:$0xff]  ;;  %v160_v51 = vadd.f32 %v159_v41, %v158_v45  ;;  %v104_v52 = vsel %vm82_vm1, %v27_v42, 0.0  ;;  %v163_v53 = vsel %vm82_vm1, %v54_v44, 0.0 }
  0x13   :  { %v101_v49 = vadd.f32 %v100_v40, %v99_v43  ;;  %v29_v54 = vld [vmem:[%s562_s0 + $0x68] sm:$0xff]  ;;  %v56_v56 = vld [vmem:[%s562_s0 + $0x140] sm:$0xff]  ;;  %v106_v58 = vsel %vm82_vm1, %v28_v48, 0.0  ;;  %v165_v59 = vsel %vm82_vm1, %v55_v50, 0.0  ;;  %v30_v60 = vld [vmem:[%s562_s0 + $0x70] sm:$0xff]  ;;  %s241_s21 = sshll.u32 %s563_s1, 4  ;;  %s242_s21 = int_to_ptr.hbm [resolvable:$true] %s241_s21 }
  0x14   :  { %v162_v57 = vadd.f32 %v161_v47, %v160_v51  ;;  %v57_v62 = vld [vmem:[%s562_s0 + $0x148] sm:$0xff]  ;;  %v108_v0 = vsel %vm82_vm1, %v29_v54, 0.0  ;;  %v167_v1 = vsel %vm82_vm1, %v56_v56, 0.0  ;;  %v31_v2 = vld [vmem:[%s562_s0 + $0x78] sm:$0xff]  ;;  %v58_v4 = vld [vmem:[%s562_s0 + $0x150] sm:$0xff]  ;;  %v110_v6 = vsel %vm82_vm1, %v30_v60, 0.0 }
  0x15   :  { %v103_v55 = vadd.f32 %v102_v46, %v101_v49  ;;  %v169_v7 = vsel %vm82_vm1, %v57_v62, 0.0  ;;  %v32_v8 = vld [vmem:[%s562_s0 + $0x80] sm:$0xff]  ;;  %v59_v10 = vld [vmem:[%s562_s0 + $0x158] sm:$0xff]  ;;  %v112_v12 = vsel %vm82_vm1, %v31_v2, 0.0  ;;  %v171_v13 = vsel %vm82_vm1, %v58_v4, 0.0  ;;  %v33_v14 = vld [vmem:[%s562_s0 + $0x88] sm:$0xff] }
  0x16   :  { %v164_v63 = vadd.f32 %v163_v53, %v162_v57  ;;  %v60_v16 = vld [vmem:[%s562_s0 + $0x160] sm:$0xff]  ;;  %v114_v18 = vsel %vm82_vm1, %v32_v8, 0.0  ;;  %v173_v19 = vsel %vm82_vm1, %v59_v10, 0.0  ;;  %v34_v20 = vld [vmem:[%s562_s0 + $0x90] sm:$0xff]  ;;  %v61_v22 = vld [vmem:[%s562_s0 + $0x168] sm:$0xff]  ;;  %v116_v24 = vsel %vm82_vm1, %v33_v14, 0.0 }
  0x17   :  { %v105_v61 = vadd.f32 %v104_v52, %v103_v55  ;;  %v175_v25 = vsel %vm82_vm1, %v60_v16, 0.0  ;;  %v35_v26 = vld [vmem:[%s562_s0 + $0x98] sm:$0xff]  ;;  %v62_v28 = vld [vmem:[%s562_s0 + $0x170] sm:$0xff]  ;;  %v118_v30 = vsel %vm82_vm1, %v34_v20, 0.0  ;;  %v177_v31 = vsel %vm82_vm1, %v61_v22, 0.0  ;;  %v36_v32 = vld [vmem:[%s562_s0 + $0xa0] sm:$0xff] }
  0x18   :  { %v166_v5 = vadd.f32 %v165_v59, %v164_v63  ;;  %v63_v34 = vld [vmem:[%s562_s0 + $0x178] sm:$0xff]  ;;  %v120_v36 = vsel %vm82_vm1, %v35_v26, 0.0  ;;  %v179_v37 = vsel %vm82_vm1, %v62_v28, 0.0  ;;  %v37_v38 = vld [vmem:[%s562_s0 + $0xa8] sm:$0xff]  ;;  %v64_v40 = vld [vmem:[%s562_s0 + $0x180] sm:$0xff]  ;;  %v122_v42 = vsel %vm82_vm1, %v36_v32, 0.0 }
  0x19   :  { %v107_v3 = vadd.f32 %v106_v58, %v105_v61  ;;  %v181_v43 = vsel %vm82_vm1, %v63_v34, 0.0  ;;  %v38_v44 = vld [vmem:[%s562_s0 + $0xb0] sm:$0xff]  ;;  %v65_v46 = vld [vmem:[%s562_s0 + $0x188] sm:$0xff]  ;;  %v124_v48 = vsel %vm82_vm1, %v37_v38, 0.0  ;;  %v183_v49 = vsel %vm82_vm1, %v64_v40, 0.0  ;;  %v39_v50 = vld [vmem:[%s562_s0 + $0xb8] sm:$0xff] }
  0x1a   :  { %v168_v11 = vadd.f32 %v167_v1, %v166_v5  ;;  %v66_v52 = vld [vmem:[%s562_s0 + $0x190] sm:$0xff]  ;;  %v126_v54 = vsel %vm82_vm1, %v38_v44, 0.0  ;;  %v185_v55 = vsel %vm82_vm1, %v65_v46, 0.0  ;;  %v40_v56 = vld [vmem:[%s562_s0 + $0xc0] sm:$0xff]  ;;  %v67_v58 = vld [vmem:[%s562_s0 + $0x198] sm:$0xff]  ;;  %v128_v60 = vsel %vm82_vm1, %v39_v50, 0.0 }
  0x1b   :  { %v109_v9 = vadd.f32 %v108_v0, %v107_v3  ;;  %v187_v61 = vsel %vm82_vm1, %v66_v52, 0.0  ;;  %v41_v62 = vld [vmem:[%s562_s0 + $0xc8] sm:$0xff]  ;;  %v68_v0 = vld [vmem:[%s562_s0 + $0x1a0] sm:$0xff]  ;;  %v130_v2 = vsel %vm82_vm1, %v40_v56, 0.0  ;;  %v189_v3 = vsel %vm82_vm1, %v67_v58, 0.0  ;;  %v42_v4 = vld [vmem:[%s562_s0 + $0xd0] sm:$0xff] }
  0x1c   :  { %v170_v17 = vadd.f32 %v169_v7, %v168_v11  ;;  %v132_v8 = vsel %vm82_vm1, %v41_v62, 0.0  ;;  %v43_v10 = vld [vmem:[%s562_s0 + $0xd8] sm:$0xff]  ;;  %v134_v14 = vsel %vm82_vm1, %v42_v4, 0.0  ;;  %v44_v16 = vld [vmem:[%s562_s0 + $0xe0] sm:$0xff]  ;;  %v45_v22 = vld [vmem:[%s562_s0 + $0xe8] sm:$0xff]  ;;  %s285_s22 = smov 16  }
  0x1d   :  { %v111_v15 = vadd.f32 %v110_v6, %v109_v9  ;;  %v69_v6 = vld [vmem:[%s562_s0 + $0x1a8] sm:$0xff]  ;;  %v191_v9 = vsel %vm82_vm1, %v68_v0, 0.0  ;;  %v136_v20 = vsel %vm82_vm1, %v43_v10, 0.0  ;;  %v138_v26 = vsel %vm82_vm1, %v44_v16, 0.0  ;;  %v46_v28 = vld [vmem:[%s562_s0 + $0xf0] sm:$0xff]  ;;  %v47_v34 = vld [vmem:[%s562_s0 + $0xf8] sm:$0xff] }
  0x1e   :  { %v172_v23 = vadd.f32 %v171_v13, %v170_v17  ;;  %v140_v32 = vsel %vm82_vm1, %v45_v22, 0.0  ;;  %v142_v38 = vsel %vm82_vm1, %v46_v28, 0.0  ;;  %v76_v46 = vld [vmem:[%s562_s0 + $0x1e0] sm:$0xff]  ;;  %v77_v50 = vld [vmem:[%s562_s0 + $0x1e8] sm:$0xff]  ;;  %v79_v58 = vld [vmem:[%s562_s0 + $0x1f8] sm:$0xff]  ;;  %s286_s23 = smov 1  }
  0x1f   :  { %v113_v21 = vadd.f32 %v112_v12, %v111_v15  ;;  %v70_v12 = vld [vmem:[%s562_s0 + $0x1b0] sm:$0xff]  ;;  %v193_v15 = vsel %vm82_vm1, %v69_v6, 0.0  ;;  %v207_v52 = vsel %vm82_vm1, %v76_v46, 0.0  ;;  %v209_v56 = vsel %vm82_vm1, %v77_v50, 0.0  ;;  %v80_v4 = vld [vmem:[#allocation2] sm:$0x1] }
  0x20   :  { %v174_v29 = vadd.f32 %v173_v19, %v172_v23 }
  0x21   :  { %v115_v27 = vadd.f32 %v114_v18, %v113_v21  ;;  %v71_v18 = vld [vmem:[%s562_s0 + $0x1b8] sm:$0xff]  ;;  %v195_v21 = vsel %vm82_vm1, %v70_v12, 0.0  ;;  %v81_v12 = vld [vmem:[#allocation2 + $0x1] sm:$0x1] }
  0x22   :  { %v176_v35 = vadd.f32 %v175_v25, %v174_v29 }
  0x23   :  { %v117_v33 = vadd.f32 %v116_v24, %v115_v27  ;;  %v72_v24 = vld [vmem:[%s562_s0 + $0x1c0] sm:$0xff]  ;;  %v197_v27 = vsel %vm82_vm1, %v71_v18, 0.0 }
  0x24   :  { %v178_v41 = vadd.f32 %v177_v31, %v176_v35 }
  0x25   :  { %v119_v39 = vadd.f32 %v118_v30, %v117_v33  ;;  %v73_v30 = vld [vmem:[%s562_s0 + $0x1c8] sm:$0xff]  ;;  %v199_v33 = vsel %vm82_vm1, %v72_v24, 0.0 }
  0x26   :  { %v180_v47 = vadd.f32 %v179_v37, %v178_v41  ;;  %v75_v41 = vld [vmem:[%s562_s0 + $0x1d8] sm:$0xff] }
  0x27   :  { %v121_v45 = vadd.f32 %v120_v36, %v119_v39  ;;  %v74_v36 = vld [vmem:[%s562_s0 + $0x1d0] sm:$0xff]  ;;  %v201_v39 = vsel %vm82_vm1, %v73_v30, 0.0 }
  0x28   :  { %v182_v53 = vadd.f32 %v181_v43, %v180_v47  ;;  %v144_v43 = vsel %vm82_vm1, %v47_v34, 0.0  ;;  %v203_v44 = vsel %vm82_vm1, %v74_v36, 0.0 }
  0x29   :  { %v123_v51 = vadd.f32 %v122_v42, %v121_v45 }
  0x2a   :  { %v184_v59 = vadd.f32 %v183_v49, %v182_v53 }
  0x2b   :  { %v125_v57 = vadd.f32 %v124_v48, %v123_v51  ;;  %v205_v48 = vsel %vm82_vm1, %v75_v41, 0.0 }
  0x2c   :  { %v186_v1 = vadd.f32 %v185_v55, %v184_v59 }
  0x2d   :  { %v127_v63 = vadd.f32 %v126_v54, %v125_v57  ;;  %v78_v54 = vld [vmem:[%s562_s0 + $0x1f0] sm:$0xff]  ;;  %s284_s0 = smov [#allocation3]  }
  0x2e   :  { %v188_v7 = vadd.f32 %v187_v61, %v186_v1  ;;  %s239_s18 = sshll.u32 %s284_s0, 4  ;;  %s240_s18 = int_to_ptr.vmem [resolvable:$true] %s239_s18 }
  0x2f   :  { %v129_v5 = vadd.f32 %v128_v60, %v127_v63  ;;  %v211_v60 = vsel %vm82_vm1, %v78_v54, 0.0  ;;  %v213_v63 = vsel %vm82_vm1, %v79_v58, 0.0 }
  0x30   :  { %v190_v13 = vadd.f32 %v189_v3, %v188_v7 }
  0x31   :  { %v131_v11 = vadd.f32 %v130_v2, %v129_v5 }
  0x32   :  { %v192_v19 = vadd.f32 %v191_v9, %v190_v13 }
  0x33   :  { %v133_v17 = vadd.f32 %v132_v8, %v131_v11 }
  0x34   :  { %v194_v25 = vadd.f32 %v193_v15, %v192_v19 }
  0x35   :  { %v135_v23 = vadd.f32 %v134_v14, %v133_v17 }
  0x36   :  { %v196_v31 = vadd.f32 %v195_v21, %v194_v25 }
  0x37   :  { %v137_v29 = vadd.f32 %v136_v20, %v135_v23 }
  0x38   :  { %v198_v37 = vadd.f32 %v197_v27, %v196_v31 }
  0x39   :  { %v139_v35 = vadd.f32 %v138_v26, %v137_v29 }
  0x3a   :  { %v200_v42 = vadd.f32 %v199_v33, %v198_v37 }
  0x3b   :  { %v141_v40 = vadd.f32 %v140_v32, %v139_v35 }
  0x3c   :  { %v202_v47 = vadd.f32 %v201_v39, %v200_v42 }
  0x3d   :  { %v143_v45 = vadd.f32 %v142_v38, %v141_v40 }
  0x3e   :  { %v204_v51 = vadd.f32 %v203_v44, %v202_v47 }
  0x3f   :  { %v145_v49 = vadd.f32 %v144_v43, %v143_v45 }
  0x40   :  { %v206_v55 = vadd.f32 %v205_v48, %v204_v51 }
  0x41   :  { %v146_v53 = vrot.slane %v145_v49, 4 }
  0x42   :  { %v208_v59 = vadd.f32 %v207_v52, %v206_v55 }
  0x43   :  { %v147_v57 = vadd.f32 %v146_v53, %v145_v49 }
  0x44   :  { %v210_v62 = vadd.f32 %v209_v56, %v208_v59 }
  0x45   :  { %v148_v61 = vrot.slane %v147_v57, 2 }
  0x46   :  { %v212_v1 = vadd.f32 %v211_v60, %v210_v62 }
  0x47   :  { %v149_v0 = vadd.f32 %v148_v61, %v147_v57 }
  0x48   :  { %v214_v3 = vadd.f32 %v213_v63, %v212_v1 }
  0x49   :  { %v150_v2 = vrot.slane %v149_v0, 1 }
  0x4a   :  { %v215_v6 = vrot.slane %v214_v3, 4 }
  0x4b   :  { %v151_v5 = vadd.f32 %v150_v2, %v149_v0 }
  0x4c   :  { %v216_v8 = vadd.f32 %v215_v6, %v214_v3 }
  0x4d   :  { %v221_v7 = vadd.f32 %v151_v5, %v80_v4 }
  0x4e   :  { %v217_v9 = vrot.slane %v216_v8, 2 }
  0x4f   :  { %224 = vst.msk [vmem:[#allocation2] sm:$0x1] %vm13_vm0, %v221_v7 }
  0x50   :  { %v218_v10 = vadd.f32 %v217_v9, %v216_v8 }
  0x52   :  { %v219_v11 = vrot.slane %v218_v10, 1 }
  0x54   :  { %v220_v13 = vadd.f32 %v219_v11, %v218_v10 }
  0x56   :  { %v229_v14 = vld [vmem:[#allocation2] sm:$0x1]  ;;  %v222_v15 = vadd.f32 %v220_v13, %v81_v12 }
  0x57   :  { %v231_v16 = vmul.f32 0.00390625, %v229_v14 }
  0x58   :  { %225 = vst.msk [vmem:[#allocation2 + $0x1] sm:$0x1] %vm13_vm0, %v222_v15 }
  0x59   :  { %233 = vst.msk [vmem:[#allocation3] sm:$0x1] %vm13_vm0, %v231_v16 }
  0x5f   :  { %v230_v17 = vld [vmem:[#allocation2 + $0x1] sm:$0x1] }
  0x60   :  { %v232_v18 = vmul.f32 0.00390625, %v230_v17 }
  0x62   :  { %234 = vst.msk [vmem:[#allocation3 + $0x1] sm:$0x1] %vm13_vm0, %v232_v18 }
  0x63   :  { %247 = dma.vmem_to_hbm [thread:$0]  %s240_s18, 32, %s242_s21, [#allocation4], %s285_s22, %s285_s22, %s286_s23  }
  0x64   :  { %281 = dma.done.wait [#allocation4], 32  }
  0x65   :  { %282 = vsyncadd [#allocation4], 4294967264 }
  0x66   :  { %252 = vsyncpa [#allocation4], 1 }

</bundles_post_ra>
